<compile_context>
chip_gen: v5e
topology: v5e:2x2
jax: 0.10.0
libtpu: 0.0.40
codegen_flags: <defaults>
</compile_context>

<pallas_src>
import jax
import jax.numpy as jnp
import numpy as np
from jax.experimental import pallas as pl
from jax.experimental.pallas import tpu as pltpu

HIDDEN = 512
DROP_P = 0.5
DROP_SCALE = 1.0 / (1.0 - DROP_P)          # = 2.0
SCALE = float(np.sqrt(1.0 / 512.0))

# approx reciprocal lowers to the EUP vrcp slot on TPU; fall back to the exact
# form when lowering for a non-TPU backend (e.g. interpret-mode checks on CPU).
_APPROX_RECIP = jax.default_backend() == "tpu"


def _sfdp_kernel(x2_ref, wt_ref, b_ref, bits_ref, o_ref):
    # --- value projection: (1,512) @ (512,512) bf16 MXU matmul, f32 accum ---
    x2 = x2_ref[...].astype(jnp.bfloat16)              # (1, 512)
    y = jnp.dot(x2, wt_ref[...],
                preferred_element_type=jnp.float32)    # (1, 512) f32
    y = jnp.tanh(y + b_ref[...])

    # --- scale + softmax over the last dim ---
    y = y * SCALE
    m = jnp.max(y, axis=-1, keepdims=True)
    e = jnp.exp(y - m)
    denom = jnp.sum(e, axis=-1, keepdims=True)         # (1, 1)
    inv = pl.reciprocal(denom, approx=_APPROX_RECIP)   # (1, 1)

    # --- dropout (p=0.5, training mode) ---
    # keep iff the sign bit of the random word is set (exact keep-prob 0.5);
    # the 1/(1-p) = 2.0 survivor scale is folded into the select so the
    # epilogue is just one select + two multiplies.
    keep = bits_ref[...] < 0                            # (1, 512) bool
    drop_scale = jnp.where(keep, DROP_SCALE, 0.0)       # (1, 512) f32
    o_ref[...] = e * (drop_scale * inv)


@jax.jit
def model_forward(x1, x2, params, dropout_key):
    """Pallas implementation of Model.forward.

    x1 is accepted for signature fidelity but (per the reference module) does
    not influence the output.  `dropout_key` must vary per step/replica for
    non-degenerate training-mode dropout.
    """
    del x1  # dead code in the reference forward (qk is overwritten)

    # Random words for the dropout mask, viewed as int32 so the in-kernel test
    # is a cheap signed compare against 0.
    bits = jax.lax.bitcast_convert_type(
        jax.random.bits(dropout_key, (1, HIDDEN), dtype=jnp.uint32),
        jnp.int32)

    return pl.pallas_call(
        _sfdp_kernel,
        out_shape=jax.ShapeDtypeStruct((1, HIDDEN), jnp.float32),
        # Single program, no grid: total footprint (~0.5 MiB bf16 weight +
        # a few KiB of vectors) fits VMEM on all generations; tiling would
        # only add per-step overhead.
        in_specs=[
            pl.BlockSpec(memory_space=pltpu.MemorySpace.VMEM),  # x2
            pl.BlockSpec(memory_space=pltpu.MemorySpace.VMEM),  # W_value^T bf16
            pl.BlockSpec(memory_space=pltpu.MemorySpace.VMEM),  # bias (1,512)
            pl.BlockSpec(memory_space=pltpu.MemorySpace.VMEM),  # dropout bits
        ],
        out_specs=pl.BlockSpec(memory_space=pltpu.MemorySpace.VMEM),
    )(x2, params["value_proj_wt_bf16"], params["value_proj_b"], bits)


def init_params(key):
    """Deterministic parameter init matching Linear(512, 512) x2.

    The value-projection weight is stored pre-transposed ((in, out)) and in
    bfloat16 so no per-call transpose/cast is ever materialized; bias stays
    f32.  qk_proj is initialized but unused (dead code in the reference)."""
    k1, k2, k3, k4 = jax.random.split(key, 4)
    bound = 1.0 / np.sqrt(HIDDEN)
    w_qk = jax.random.uniform(k1, (HIDDEN, HIDDEN), jnp.float32, -bound, bound)
    b_qk = jax.random.uniform(k2, (HIDDEN,), jnp.float32, -bound, bound)
    w_v = jax.random.uniform(k3, (HIDDEN, HIDDEN), jnp.float32, -bound, bound)
    b_v = jax.random.uniform(k4, (HIDDEN,), jnp.float32, -bound, bound)
    return {
        # dead code in forward, kept for module fidelity
        "qk_proj_w": w_qk,
        "qk_proj_b": b_qk,
        # hot-path params, stored in kernel-ready layout/dtype
        "value_proj_wt_bf16": jnp.asarray(w_v.T, dtype=jnp.bfloat16),
        "value_proj_b": b_v.reshape(1, HIDDEN),
    }


if __name__ == "__main__":
    root = jax.random.PRNGKey(0)
    kp, kx1, kx2, kdrop = jax.random.split(root, 4)
    params = init_params(kp)
    x1 = jax.random.normal(kx1, (1, HIDDEN), dtype=jnp.float32)
    x2 = jax.random.normal(kx2, (1, HIDDEN), dtype=jnp.float32)

    out = model_forward(x1, x2, params, kdrop)
    out = jax.block_until_ready(out)

    assert out.shape == (1, HIDDEN)
    assert out.dtype == jnp.float32
    assert bool(jnp.all(jnp.isfinite(out)))
    print("KERNEL_OK")
</pallas_src>

<mosaic_0001>
module attributes {stable_mosaic.version = 11 : i64} {
  func.func @_sfdp_kernel(%arg0: memref<1x512xf32, #tpu.memory_space<vmem>>, %arg1: memref<512x512xbf16, #tpu.memory_space<vmem>>, %arg2: memref<1x512xf32, #tpu.memory_space<vmem>>, %arg3: memref<1x512xi32, #tpu.memory_space<vmem>>, %arg4: memref<1x512xf32, #tpu.memory_space<vmem>>) attributes {dimension_semantics = [], scalar_prefetch = 0 : i64, scratch_operands = 0 : i64, tpu.core_type = #tpu.core_type<tc>} {
    %c0 = arith.constant 0 : index
    %c0_0 = arith.constant 0 : index
    %0 = vector.load %arg0[%c0, %c0_0] : memref<1x512xf32, #tpu.memory_space<vmem>>, vector<1x512xf32>
    %1 = arith.truncf %0 : vector<1x512xf32> to vector<1x512xbf16>
    %c0_1 = arith.constant 0 : index
    %c0_2 = arith.constant 0 : index
    %2 = vector.load %arg1[%c0_1, %c0_2] : memref<512x512xbf16, #tpu.memory_space<vmem>>, vector<512x512xbf16>
    %cst = arith.constant dense<0.000000e+00> : vector<1x512xf32>
    %3 = tpu.matmul %1, %2, %cst {dimension_numbers = #tpu.dot_dimension_numbers<[1], [0], [0], [1], [0, 0, 1, 1], [], []>} : vector<1x512xbf16>, vector<512x512xbf16>, vector<1x512xf32> -> vector<1x512xf32>
    %c0_3 = arith.constant 0 : index
    %c0_4 = arith.constant 0 : index
    %4 = vector.load %arg2[%c0_3, %c0_4] : memref<1x512xf32, #tpu.memory_space<vmem>>, vector<1x512xf32>
    %5 = arith.addf %3, %4 : vector<1x512xf32>
    %6 = math.tanh %5 : vector<1x512xf32>
    %cst_5 = arith.constant 0.0441941731 : f32
    %7 = vector.broadcast %cst_5 : f32 to vector<1x512xf32>
    %8 = arith.mulf %6, %7 : vector<1x512xf32>
    %cst_6 = arith.constant dense<0xFF800000> : vector<1xf32>
    %9 = vector.multi_reduction <maximumf>, %8, %cst_6 [1] : vector<1x512xf32> to vector<1xf32>
    %10 = vector.shape_cast %9 : vector<1xf32> to vector<1x1xf32>
    %11 = vector.broadcast %10 : vector<1x1xf32> to vector<1x512xf32>
    %12 = arith.subf %8, %11 : vector<1x512xf32>
    %13 = math.exp %12 : vector<1x512xf32>
    %cst_7 = arith.constant dense<0.000000e+00> : vector<1xf32>
    %14 = vector.multi_reduction <add>, %13, %cst_7 [1] : vector<1x512xf32> to vector<1xf32>
    %15 = vector.shape_cast %14 : vector<1xf32> to vector<1x1xf32>
    %16 = tpu.reciprocal %15 : vector<1x1xf32> -> vector<1x1xf32>
    %c0_8 = arith.constant 0 : index
    %c0_9 = arith.constant 0 : index
    %17 = vector.load %arg3[%c0_8, %c0_9] : memref<1x512xi32, #tpu.memory_space<vmem>>, vector<1x512xi32>
    %c0_i32 = arith.constant 0 : i32
    %18 = vector.broadcast %c0_i32 : i32 to vector<1x512xi32>
    %19 = arith.cmpi slt, %17, %18 : vector<1x512xi32>
    %cst_10 = arith.constant 2.000000e+00 : f32
    %cst_11 = arith.constant 0.000000e+00 : f32
    %20 = vector.broadcast %cst_10 : f32 to vector<1x512xf32>
    %21 = vector.broadcast %cst_11 : f32 to vector<1x512xf32>
    %22 = arith.select %19, %20, %21 : vector<1x512xi1>, vector<1x512xf32>
    %23 = vector.broadcast %16 : vector<1x1xf32> to vector<1x512xf32>
    %24 = arith.mulf %22, %23 : vector<1x512xf32>
    %25 = arith.mulf %13, %24 : vector<1x512xf32>
    %c0_12 = arith.constant 0 : index
    %c0_13 = arith.constant 0 : index
    %26 = vector.load %arg4[%c0_12, %c0_13] : memref<1x512xf32, #tpu.memory_space<vmem>>, vector<1x512xf32>
    tpu.vector_store %arg4[%c0_12, %c0_13], %25 {strides = array<i32>} : memref<1x512xf32, #tpu.memory_space<vmem>>, vector<1x512xf32>,
    return
  }
}

</mosaic_0001>

<bundles_post_ra>
// kernel: model_forward.1
= control target key start
LH: loop header
LB: loop body
LE: loop exit
PB: predicated region body
PF: predicated region fallthrough
CT: control target
= control target key end

     0   :  { %9 = vsyncpa [#allocation3], 0  ;;  %s1935_s0 = inlined_call_operand.vmem [shape: f32[1,512], index: 0, kind: input, shape index: {}]   ;;  %s1936_s1 = inlined_call_operand.hbm [shape: bf16[512,512], index: 1, kind: input, shape index: {}]   ;;  %s1937_s2 = inlined_call_operand.vmem [shape: f32[1,512], index: 2, kind: input, shape index: {}]   ;;  %s1938_s3 = inlined_call_operand.vmem [shape: s32[1,512], index: 3, kind: input, shape index: {}]   ;;  %s1939_s4 = inlined_call_operand.hbm [shape: f32[1,512], index: 4, kind: output, shape index: {}]  }
   0x1   :  { %10 = vsyncpa [#allocation4], 0  ;;  %s17_s17 = sshll.u32 %s1936_s1, 4  ;;  %s1857_s18 = smov [#allocation2]   ;;  %s18_s17 = int_to_ptr.hbm [resolvable:$true] %s17_s17 }
   0x2   :  { %s19_s19 = sshll.u32 %s1857_s18, 4  ;;  %s1858_s20 = smov 256   ;;  %s20_s19 = int_to_ptr.vmem [resolvable:$true] %s19_s19 }
   0x3   :  { %s1859_s21 = smov 16  }
   0x4   :  { %25 = dma.hbm_to_vmem [thread:$0]  %s18_s17, 16384, %s20_s19, [#allocation3], %s1858_s20, %s1858_s20, %s1859_s21  }
   0x5   :  { %1853 = dma.done.wait [#allocation3], 16384  }
   0x6   :  { %1854 = vsyncadd [#allocation3], 4294950912  ;;  %v1256_v0 = vld [vmem:[#allocation2 + $0xe0] sm:$0xf]  ;;  %v1684_v1 = vld [vmem:[#allocation2 + $0xec] sm:$0xf0] }
   0x7   :  { %v1384_v2 = vld [vmem:[#allocation2 + $0x1e0] sm:$0xf]  ;;  %v1257_v3 = vor.u32 %v1684_v1, %v1256_v0  ;;  %v1716_v4 = vld [vmem:[#allocation2 + $0x1ec] sm:$0xf0]  ;;  %vm1042_vm0 = vcmask 1040384   ;;  %vm1115_vm6 = vcmask 1042434  }
   0x8   :  { %v1512_v5 = vld [vmem:[#allocation2 + $0x2e0] sm:$0xf]  ;;  %v1748_v6 = vld [vmem:[#allocation2 + $0x2ec] sm:$0xf0]  ;;  %v1385_v7 = vor.u32 %v1716_v4, %v1384_v2  ;;  %vm1117_vm7 = vcmask 1041408   ;;  %s1132_s28 = sshll.u32 %s1939_s4, 4  ;;  %s1133_s28 = int_to_ptr.hbm [resolvable:$true] %s1132_s28 }
   0x9   :  { %v1513_v8 = vor.u32 %v1748_v6, %v1512_v5  ;;  %v1640_v9 = vld [vmem:[#allocation2 + $0x3e0] sm:$0xf]  ;;  %v1780_v10 = vld [vmem:[#allocation2 + $0x3ec] sm:$0xf0]  ;;  %826 = vmatpush.bf16.msra.mxu0 %v1257_v3 }
   0xa   :  { %v1240_v11 = vld [vmem:[#allocation2 + $0xc0] sm:$0xf]  ;;  %v1641_v12 = vor.u32 %v1780_v10, %v1640_v9  ;;  %v1680_v13 = vld [vmem:[#allocation2 + $0xcc] sm:$0xf0]  ;;  %839 = vmatpush.bf16.msra.mxu1 %v1385_v7 }
   0xb   :  { %v1368_v14 = vld [vmem:[#allocation2 + $0x1c0] sm:$0xf]  ;;  %v1712_v15 = vld [vmem:[#allocation2 + $0x1cc] sm:$0xf0]  ;;  %852 = vmatpush.bf16.msra.mxu2 %v1513_v8  ;;  %v1241_v16 = vor.u32 %v1680_v13, %v1240_v11 }
   0xc   :  { %v1369_v17 = vor.u32 %v1712_v15, %v1368_v14  ;;  %v1496_v18 = vld [vmem:[#allocation2 + $0x2c0] sm:$0xf]  ;;  %v1744_v19 = vld [vmem:[#allocation2 + $0x2cc] sm:$0xf0]  ;;  %865 = vmatpush.bf16.msra.mxu3 %v1641_v12 }
   0xd   :  { %v1624_v20 = vld [vmem:[#allocation2 + $0x3c0] sm:$0xf]  ;;  %v1497_v21 = vor.u32 %v1744_v19, %v1496_v18  ;;  %v1776_v22 = vld [vmem:[#allocation2 + $0x3cc] sm:$0xf0]  ;;  %827 = vmatpush.bf16.msra.mxu0 %v1241_v16 }
   0xe   :  { %v1224_v23 = vld [vmem:[#allocation2 + $0xa0] sm:$0xf]  ;;  %v1676_v24 = vld [vmem:[#allocation2 + $0xac] sm:$0xf0]  ;;  %v1625_v25 = vor.u32 %v1776_v22, %v1624_v20  ;;  %840 = vmatpush.bf16.msra.mxu1 %v1369_v17 }
   0xf   :  { %v1352_v26 = vld [vmem:[#allocation2 + $0x1a0] sm:$0xf]  ;;  %v1708_v27 = vld [vmem:[#allocation2 + $0x1ac] sm:$0xf0]  ;;  %v1225_v29 = vor.u32 %v1676_v24, %v1224_v23  ;;  %853 = vmatpush.bf16.msra.mxu2 %v1497_v21 }
  0x10   :  { %v1480_v28 = vld [vmem:[#allocation2 + $0x2a0] sm:$0xf]  ;;  %v1740_v30 = vld [vmem:[#allocation2 + $0x2ac] sm:$0xf0]  ;;  %v1353_v33 = vor.u32 %v1708_v27, %v1352_v26  ;;  %866 = vmatpush.bf16.msra.mxu3 %v1625_v25 }
  0x11   :  { %v1608_v31 = vld [vmem:[#allocation2 + $0x3a0] sm:$0xf]  ;;  %v1772_v32 = vld [vmem:[#allocation2 + $0x3ac] sm:$0xf0]  ;;  %v1481_v34 = vor.u32 %v1740_v30, %v1480_v28  ;;  %828 = vmatpush.bf16.msra.mxu0 %v1225_v29  ;;  %v1682_v28 = vld [vmem:[#allocation2 + $0xe4] sm:$0xf] }
  0x12   :  { %v1208_v35 = vld [vmem:[#allocation2 + $0x80] sm:$0xf]  ;;  %v1672_v36 = vld [vmem:[#allocation2 + $0x8c] sm:$0xf0]  ;;  %v1609_v38 = vor.u32 %v1772_v32, %v1608_v31  ;;  %841 = vmatpush.bf16.msra.mxu1 %v1353_v33  ;;  %v1258_v29 = vld [vmem:[#allocation2 + $0xf0] sm:$0xf0] }
  0x13   :  { %v1336_v37 = vld [vmem:[#allocation2 + $0x180] sm:$0xf]  ;;  %v1704_v39 = vld [vmem:[#allocation2 + $0x18c] sm:$0xf0]  ;;  %v1209_v44 = vor.u32 %v1672_v36, %v1208_v35  ;;  %854 = vmatpush.bf16.msra.mxu2 %v1481_v34  ;;  %v1714_v30 = vld [vmem:[#allocation2 + $0x1e4] sm:$0xf] }
  0x14   :  { %v1464_v40 = vld [vmem:[#allocation2 + $0x280] sm:$0xf]  ;;  %v1736_v41 = vld [vmem:[#allocation2 + $0x28c] sm:$0xf0]  ;;  %v1337_v45 = vor.u32 %v1704_v39, %v1336_v37  ;;  %867 = vmatpush.bf16.msra.mxu3 %v1609_v38  ;;  %v1386_v32 = vld [vmem:[#allocation2 + $0x1f0] sm:$0xf0] }
  0x15   :  { %v1592_v42 = vld [vmem:[#allocation2 + $0x380] sm:$0xf]  ;;  %v1768_v43 = vld [vmem:[#allocation2 + $0x38c] sm:$0xf0]  ;;  %v1465_v46 = vor.u32 %v1736_v41, %v1464_v40  ;;  %829 = vmatpush.bf16.msra.mxu0 %v1209_v44  ;;  %v1746_v33 = vld [vmem:[#allocation2 + $0x2e4] sm:$0xf]  ;;  %v1261_v40 = vor.u32 %v1682_v28, %v1258_v29  ;;  %v1389_v41 = vor.u32 %v1714_v30, %v1386_v32 }
  0x16   :  { %v1192_v47 = vld [vmem:[#allocation2 + $0x60] sm:$0xf]  ;;  %v1668_v48 = vld [vmem:[#allocation2 + $0x6c] sm:$0xf0]  ;;  %v1593_v50 = vor.u32 %v1768_v43, %v1592_v42  ;;  %842 = vmatpush.bf16.msra.mxu1 %v1337_v45  ;;  %v1514_v34 = vld [vmem:[#allocation2 + $0x2f0] sm:$0xf0] }
  0x17   :  { %v1320_v49 = vld [vmem:[#allocation2 + $0x160] sm:$0xf]  ;;  %v1700_v51 = vld [vmem:[#allocation2 + $0x16c] sm:$0xf0]  ;;  %v1193_v56 = vor.u32 %v1668_v48, %v1192_v47  ;;  %855 = vmatpush.bf16.msra.mxu2 %v1465_v46  ;;  %v1778_v37 = vld [vmem:[#allocation2 + $0x3e4] sm:$0xf]  ;;  %v1517_v42 = vor.u32 %v1746_v33, %v1514_v34 }
  0x18   :  { %v1448_v52 = vld [vmem:[#allocation2 + $0x260] sm:$0xf]  ;;  %v1732_v53 = vld [vmem:[#allocation2 + $0x26c] sm:$0xf0]  ;;  %v1321_v57 = vor.u32 %v1700_v51, %v1320_v49  ;;  %868 = vmatpush.bf16.msra.mxu3 %v1593_v50  ;;  %v1642_v38 = vld [vmem:[#allocation2 + $0x3f0] sm:$0xf0] }
  0x19   :  { %v1576_v54 = vld [vmem:[#allocation2 + $0x360] sm:$0xf]  ;;  %v1764_v55 = vld [vmem:[#allocation2 + $0x36c] sm:$0xf0]  ;;  %v1449_v58 = vor.u32 %v1732_v53, %v1448_v52  ;;  %830 = vmatpush.bf16.msra.mxu0 %v1193_v56  ;;  %v1678_v43 = vld [vmem:[#allocation2 + $0xc4] sm:$0xf]  ;;  %v1645_v46 = vor.u32 %v1778_v37, %v1642_v38 }
  0x1a   :  { %v1176_v59 = vld [vmem:[#allocation2 + $0x40] sm:$0xf]  ;;  %v1664_v60 = vld [vmem:[#allocation2 + $0x4c] sm:$0xf0]  ;;  %v1577_v62 = vor.u32 %v1764_v55, %v1576_v54  ;;  %843 = vmatpush.bf16.msra.mxu1 %v1321_v57  ;;  %v1242_v44 = vld [vmem:[#allocation2 + $0xd0] sm:$0xf0] }
  0x1b   :  { %v1304_v61 = vld [vmem:[#allocation2 + $0x140] sm:$0xf]  ;;  %v1696_v63 = vld [vmem:[#allocation2 + $0x14c] sm:$0xf0]  ;;  %v1177_v4 = vor.u32 %v1664_v60, %v1176_v59  ;;  %856 = vmatpush.bf16.msra.mxu2 %v1449_v58  ;;  %v1710_v45 = vld [vmem:[#allocation2 + $0x1c4] sm:$0xf]  ;;  %v1245_v53 = vor.u32 %v1678_v43, %v1242_v44 }
  0x1c   :  { %v1432_v0 = vld [vmem:[#allocation2 + $0x240] sm:$0xf]  ;;  %v1728_v1 = vld [vmem:[#allocation2 + $0x24c] sm:$0xf0]  ;;  %v1305_v5 = vor.u32 %v1696_v63, %v1304_v61  ;;  %869 = vmatpush.bf16.msra.mxu3 %v1577_v62  ;;  %v1370_v47 = vld [vmem:[#allocation2 + $0x1d0] sm:$0xf0] }
  0x1d   :  { %v1560_v2 = vld [vmem:[#allocation2 + $0x340] sm:$0xf]  ;;  %v1760_v3 = vld [vmem:[#allocation2 + $0x34c] sm:$0xf0]  ;;  %v1433_v6 = vor.u32 %v1728_v1, %v1432_v0  ;;  %831 = vmatpush.bf16.msra.mxu0 %v1177_v4  ;;  %v1742_v48 = vld [vmem:[#allocation2 + $0x2c4] sm:$0xf]  ;;  %v1373_v57 = vor.u32 %v1710_v45, %v1370_v47 }
  0x1e   :  { %v1160_v7 = vld [vmem:[#allocation2 + $0x20] sm:$0xf]  ;;  %v1660_v8 = vld [vmem:[#allocation2 + $0x2c] sm:$0xf0]  ;;  %v1561_v10 = vor.u32 %v1760_v3, %v1560_v2  ;;  %844 = vmatpush.bf16.msra.mxu1 %v1305_v5  ;;  %v1498_v49 = vld [vmem:[#allocation2 + $0x2d0] sm:$0xf0] }
  0x1f   :  { %v1288_v9 = vld [vmem:[#allocation2 + $0x120] sm:$0xf]  ;;  %v1692_v11 = vld [vmem:[#allocation2 + $0x12c] sm:$0xf0]  ;;  %v1161_v16 = vor.u32 %v1660_v8, %v1160_v7  ;;  %857 = vmatpush.bf16.msra.mxu2 %v1433_v6  ;;  %v1774_v50 = vld [vmem:[#allocation2 + $0x3c4] sm:$0xf]  ;;  %v1501_v58 = vor.u32 %v1742_v48, %v1498_v49 }
  0x20   :  { %v1416_v12 = vld [vmem:[#allocation2 + $0x220] sm:$0xf]  ;;  %v1724_v13 = vld [vmem:[#allocation2 + $0x22c] sm:$0xf0]  ;;  %v1289_v19 = vor.u32 %v1692_v11, %v1288_v9  ;;  %870 = vmatpush.bf16.msra.mxu3 %v1561_v10  ;;  %v1626_v51 = vld [vmem:[#allocation2 + $0x3d0] sm:$0xf0] }
  0x21   :  { %v1544_v14 = vld [vmem:[#allocation2 + $0x320] sm:$0xf]  ;;  %v1756_v15 = vld [vmem:[#allocation2 + $0x32c] sm:$0xf0]  ;;  %v1417_v20 = vor.u32 %v1724_v13, %v1416_v12  ;;  %832 = vmatpush.bf16.msra.mxu0 %v1161_v16  ;;  %v1674_v54 = vld [vmem:[#allocation2 + $0xa4] sm:$0xf]  ;;  %v1629_v62 = vor.u32 %v1774_v50, %v1626_v51 }
  0x22   :  { %v1144_v17 = vld [vmem:[#allocation2] sm:$0xf]  ;;  %v1656_v18 = vld [vmem:[#allocation2 + $0xc] sm:$0xf0]  ;;  %v1545_v24 = vor.u32 %v1756_v15, %v1544_v14  ;;  %845 = vmatpush.bf16.msra.mxu1 %v1289_v19  ;;  %v1226_v59 = vld [vmem:[#allocation2 + $0xb0] sm:$0xf0] }
  0x23   :  { %v1272_v21 = vld [vmem:[#allocation2 + $0x100] sm:$0xf]  ;;  %v1688_v22 = vld [vmem:[#allocation2 + $0x10c] sm:$0xf0]  ;;  %v1145_v31 = vor.u32 %v1656_v18, %v1144_v17  ;;  %858 = vmatpush.bf16.msra.mxu2 %v1417_v20  ;;  %v1706_v60 = vld [vmem:[#allocation2 + $0x1a4] sm:$0xf]  ;;  %v1229_v7 = vor.u32 %v1674_v54, %v1226_v59 }
  0x24   :  { %v1400_v23 = vld [vmem:[#allocation2 + $0x200] sm:$0xf]  ;;  %v1720_v25 = vld [vmem:[#allocation2 + $0x20c] sm:$0xf0]  ;;  %v1273_v35 = vor.u32 %v1688_v22, %v1272_v21  ;;  %871 = vmatpush.bf16.msra.mxu3 %v1545_v24  ;;  %v1354_v61 = vld [vmem:[#allocation2 + $0x1b0] sm:$0xf0] }
  0x25   :  { %v1528_v26 = vld [vmem:[#allocation2 + $0x300] sm:$0xf]  ;;  %v1752_v27 = vld [vmem:[#allocation2 + $0x30c] sm:$0xf0]  ;;  %v1401_v36 = vor.u32 %v1720_v25, %v1400_v23  ;;  %833 = vmatpush.bf16.msra.mxu0 %v1145_v31  ;;  %v1738_v63 = vld [vmem:[#allocation2 + $0x2a4] sm:$0xf]  ;;  %v1357_v9 = vor.u32 %v1706_v60, %v1354_v61 }
  0x26   :  { %v1529_v39 = vor.u32 %v1752_v27, %v1528_v26  ;;  %846 = vmatpush.bf16.msra.mxu1 %v1273_v35  ;;  %v34_v52 = vld [vmem:[%s1935_s0] sm:$0xf]  ;;  %v1482_v0 = vld [vmem:[#allocation2 + $0x2b0] sm:$0xf0]  ;;  %v1770_v4 = vld [vmem:[#allocation2 + $0x3a4] sm:$0xf] }
  0x27   :  { %859 = vmatpush.bf16.msra.mxu2 %v1401_v36  ;;  %v38_v55 = vperm.slane %v34_v52, 2  ;;  %v36_v56 = vperm.slane %v34_v52, 0  ;;  %v39_v3 = vperm.slane %v34_v52, 3  ;;  %v1610_v5 = vld [vmem:[#allocation2 + $0x3b0] sm:$0xf0]  ;;  %v37_v6 = vperm.slane %v34_v52, 1 }
  0x28   :  { %872 = vmatpush.bf16.msra.mxu3 %v1529_v39  ;;  %v1485_v10 = vor.u32 %v1738_v63, %v1482_v0  ;;  %v1670_v11 = vld [vmem:[#allocation2 + $0x84] sm:$0xf]  ;;  %v1210_v12 = vld [vmem:[#allocation2 + $0x90] sm:$0xf0]  ;;  %v1613_v15 = vor.u32 %v1770_v4, %v1610_v5 }
  0x29   :  { %878 = vmatpush.bf16.msrb.mxu0 %v1261_v40  ;;  %v1893_v1 = vpack.c.bf16 %v38_v55, %v38_v55  ;;  %v1895_v2 = vpack.c.bf16 %v36_v56, %v36_v56  ;;  %v1898_v8 = vpack.c.bf16 %v39_v3, %v39_v3  ;;  %v1702_v13 = vld [vmem:[#allocation2 + $0x184] sm:$0xf]  ;;  %v1900_v14 = vpack.c.bf16 %v37_v6, %v37_v6  ;;  %v1338_v16 = vld [vmem:[#allocation2 + $0x190] sm:$0xf0] }
  0x2a   :  { %891 = vmatpush.bf16.msrb.mxu1 %v1389_v41  ;;  %v1734_v17 = vld [vmem:[#allocation2 + $0x284] sm:$0xf]  ;;  %v1466_v18 = vld [vmem:[#allocation2 + $0x290] sm:$0xf0]  ;;  %v1213_v21 = vor.u32 %v1670_v11, %v1210_v12  ;;  %v1341_v22 = vor.u32 %v1702_v13, %v1338_v16  ;;  %v1717_v12 = vld [vmem:[#allocation2 + $0x1f4] sm:$0xf0] }
  0x2b   :  { %904 = vmatpush.bf16.msrb.mxu2 %v1517_v42  ;;  %834 = vmatmul.bf16.vlgmr.msra.gmra.mxu0 %v1895_v2  ;;  %v1766_v19 = vld [vmem:[#allocation2 + $0x384] sm:$0xf]  ;;  %v1594_v20 = vld [vmem:[#allocation2 + $0x390] sm:$0xf0]  ;;  %v1469_v23 = vor.u32 %v1734_v17, %v1466_v18  ;;  %v1520_v13 = vld [vmem:[#allocation2 + $0x2e8] sm:$0xf] }
  0x2c   :  { %917 = vmatpush.bf16.msrb.mxu3 %v1645_v46  ;;  %860 = vmatmul.bf16.vlgmr.msra.gmra.mxu2 %v1893_v1  ;;  %v1666_v24 = vld [vmem:[#allocation2 + $0x64] sm:$0xf]  ;;  %v1194_v25 = vld [vmem:[#allocation2 + $0x70] sm:$0xf0]  ;;  %v1597_v27 = vor.u32 %v1766_v19, %v1594_v20  ;;  %v1648_v18 = vld [vmem:[#allocation2 + $0x3e8] sm:$0xf] }
  0x2d   :  { %879 = vmatpush.bf16.msrb.mxu0 %v1245_v53  ;;  %873 = vmatmul.bf16.vlgmr.msra.gmra.mxu3 %v1898_v8  ;;  %v1698_v26 = vld [vmem:[#allocation2 + $0x164] sm:$0xf]  ;;  %v1322_v28 = vld [vmem:[#allocation2 + $0x170] sm:$0xf0]  ;;  %v1197_v33 = vor.u32 %v1666_v24, %v1194_v25  ;;  %v1781_v19 = vld [vmem:[#allocation2 + $0x3f4] sm:$0xf0] }
  0x2e   :  { %892 = vmatpush.bf16.msrb.mxu1 %v1373_v57  ;;  %v1730_v29 = vld [vmem:[#allocation2 + $0x264] sm:$0xf]  ;;  %v1450_v30 = vld [vmem:[#allocation2 + $0x270] sm:$0xf0]  ;;  %v1325_v34 = vor.u32 %v1698_v26, %v1322_v28  ;;  %v1248_v24 = vld [vmem:[#allocation2 + $0xc8] sm:$0xf] }
  0x2f   :  { %905 = vmatpush.bf16.msrb.mxu2 %v1501_v58  ;;  %847 = vmatmul.bf16.vlgmr.msra.gmra.mxu1 %v1900_v14  ;;  %v1762_v31 = vld [vmem:[#allocation2 + $0x364] sm:$0xf]  ;;  %v1578_v32 = vld [vmem:[#allocation2 + $0x370] sm:$0xf0]  ;;  %v1453_v35 = vor.u32 %v1730_v29, %v1450_v30  ;;  %v1681_v25 = vld [vmem:[#allocation2 + $0xd4] sm:$0xf0] }
  0x30   :  { %918 = vmatpush.bf16.msrb.mxu3 %v1629_v62  ;;  %v1662_v36 = vld [vmem:[#allocation2 + $0x44] sm:$0xf]  ;;  %v1178_v37 = vld [vmem:[#allocation2 + $0x50] sm:$0xf0]  ;;  %v1581_v39 = vor.u32 %v1762_v31, %v1578_v32  ;;  %v1376_v26 = vld [vmem:[#allocation2 + $0x1c8] sm:$0xf] }
  0x31   :  { %880 = vmatpush.bf16.msrb.mxu0 %v1229_v7  ;;  %v1694_v38 = vld [vmem:[#allocation2 + $0x144] sm:$0xf]  ;;  %v1306_v40 = vld [vmem:[#allocation2 + $0x150] sm:$0xf0]  ;;  %v1181_v45 = vor.u32 %v1662_v36, %v1178_v37  ;;  %v1264_v7 = vld [vmem:[#allocation2 + $0xe8] sm:$0xf] }
  0x32   :  { %893 = vmatpush.bf16.msrb.mxu1 %v1357_v9  ;;  %v1726_v41 = vld [vmem:[#allocation2 + $0x244] sm:$0xf]  ;;  %v1434_v42 = vld [vmem:[#allocation2 + $0x250] sm:$0xf0]  ;;  %v1309_v46 = vor.u32 %v1694_v38, %v1306_v40  ;;  %v1685_v9 = vld [vmem:[#allocation2 + $0xf4] sm:$0xf0] }
  0x33   :  { %906 = vmatpush.bf16.msrb.mxu2 %v1485_v10  ;;  %v1758_v43 = vld [vmem:[#allocation2 + $0x344] sm:$0xf]  ;;  %v1562_v44 = vld [vmem:[#allocation2 + $0x350] sm:$0xf0]  ;;  %v1437_v47 = vor.u32 %v1726_v41, %v1434_v42  ;;  %v1392_v10 = vld [vmem:[#allocation2 + $0x1e8] sm:$0xf] }
  0x34   :  { %919 = vmatpush.bf16.msrb.mxu3 %v1613_v15  ;;  %v1658_v48 = vld [vmem:[#allocation2 + $0x24] sm:$0xf]  ;;  %v1162_v49 = vld [vmem:[#allocation2 + $0x30] sm:$0xf0]  ;;  %v1565_v51 = vor.u32 %v1758_v43, %v1562_v44  ;;  %v1749_v15 = vld [vmem:[#allocation2 + $0x2f4] sm:$0xf0] }
  0x35   :  { %881 = vmatpush.bf16.msrb.mxu0 %v1213_v21  ;;  %v1690_v50 = vld [vmem:[#allocation2 + $0x124] sm:$0xf]  ;;  %v1290_v52 = vld [vmem:[#allocation2 + $0x130] sm:$0xf0]  ;;  %v1165_v57 = vor.u32 %v1658_v48, %v1162_v49  ;;  %v1265_v21 = vor.u32 %v1685_v9, %v1264_v7  ;;  %v1713_v28 = vld [vmem:[#allocation2 + $0x1d4] sm:$0xf0] }
  0x36   :  { %894 = vmatpush.bf16.msrb.mxu1 %v1341_v22  ;;  %v1722_v53 = vld [vmem:[#allocation2 + $0x224] sm:$0xf]  ;;  %v1418_v54 = vld [vmem:[#allocation2 + $0x230] sm:$0xf0]  ;;  %v1293_v60 = vor.u32 %v1690_v50, %v1290_v52  ;;  %v1393_v22 = vor.u32 %v1717_v12, %v1392_v10  ;;  %v1504_v29 = vld [vmem:[#allocation2 + $0x2c8] sm:$0xf] }
  0x37   :  { %907 = vmatpush.bf16.msrb.mxu2 %v1469_v23  ;;  %v1754_v55 = vld [vmem:[#allocation2 + $0x324] sm:$0xf]  ;;  %v1546_v56 = vld [vmem:[#allocation2 + $0x330] sm:$0xf0]  ;;  %v1421_v61 = vor.u32 %v1722_v53, %v1418_v54  ;;  %v1521_v23 = vor.u32 %v1749_v15, %v1520_v13  ;;  %v1745_v30 = vld [vmem:[#allocation2 + $0x2d4] sm:$0xf0] }
  0x38   :  { %920 = vmatpush.bf16.msrb.mxu3 %v1597_v27  ;;  %v1654_v58 = vld [vmem:[#allocation2 + $0x4] sm:$0xf]  ;;  %v1146_v59 = vld [vmem:[#allocation2 + $0x10] sm:$0xf0]  ;;  %v1549_v3 = vor.u32 %v1754_v55, %v1546_v56  ;;  %v1649_v27 = vor.u32 %v1781_v19, %v1648_v18  ;;  %v1632_v31 = vld [vmem:[#allocation2 + $0x3c8] sm:$0xf] }
  0x39   :  { %882 = vmatpush.bf16.msrb.mxu0 %v1197_v33  ;;  %v1686_v62 = vld [vmem:[#allocation2 + $0x104] sm:$0xf]  ;;  %v1274_v63 = vld [vmem:[#allocation2 + $0x110] sm:$0xf0]  ;;  %v1149_v11 = vor.u32 %v1654_v58, %v1146_v59  ;;  %v1777_v32 = vld [vmem:[#allocation2 + $0x3d4] sm:$0xf0]  ;;  %v1249_v33 = vor.u32 %v1681_v25, %v1248_v24 }
  0x3a   :  { %895 = vmatpush.bf16.msrb.mxu1 %v1325_v34  ;;  %v1718_v0 = vld [vmem:[#allocation2 + $0x204] sm:$0xf]  ;;  %v1402_v4 = vld [vmem:[#allocation2 + $0x210] sm:$0xf0]  ;;  %v1277_v16 = vor.u32 %v1686_v62, %v1274_v63  ;;  %v1377_v34 = vor.u32 %v1713_v28, %v1376_v26  ;;  %v1232_v36 = vld [vmem:[#allocation2 + $0xa8] sm:$0xf] }
  0x3b   :  { %908 = vmatpush.bf16.msrb.mxu2 %v1453_v35  ;;  %v1750_v5 = vld [vmem:[#allocation2 + $0x304] sm:$0xf]  ;;  %v1530_v6 = vld [vmem:[#allocation2 + $0x310] sm:$0xf0]  ;;  %v1405_v17 = vor.u32 %v1718_v0, %v1402_v4  ;;  %v1505_v35 = vor.u32 %v1745_v30, %v1504_v29  ;;  %v1677_v37 = vld [vmem:[#allocation2 + $0xb4] sm:$0xf0] }
  0x3c   :  { %921 = vmatpush.bf16.msrb.mxu3 %v1581_v39  ;;  %v1533_v20 = vor.u32 %v1750_v5, %v1530_v6  ;;  %v1360_v38 = vld [vmem:[#allocation2 + $0x1a8] sm:$0xf]  ;;  %v1633_v39 = vor.u32 %v1777_v32, %v1632_v31  ;;  %v1709_v40 = vld [vmem:[#allocation2 + $0x1b4] sm:$0xf0] }
  0x3d   :  { %883 = vmatpush.bf16.msrb.mxu0 %v1181_v45  ;;  %v1488_v41 = vld [vmem:[#allocation2 + $0x2a8] sm:$0xf]  ;;  %v1741_v42 = vld [vmem:[#allocation2 + $0x2b4] sm:$0xf0]  ;;  %v1233_v45 = vor.u32 %v1677_v37, %v1232_v36 }
  0x3e   :  { %896 = vmatpush.bf16.msrb.mxu1 %v1309_v46  ;;  %v1616_v43 = vld [vmem:[#allocation2 + $0x3a8] sm:$0xf]  ;;  %v1773_v44 = vld [vmem:[#allocation2 + $0x3b4] sm:$0xf0]  ;;  %v1361_v46 = vor.u32 %v1709_v40, %v1360_v38 }
  0x3f   :  { %909 = vmatpush.bf16.msrb.mxu2 %v1437_v47  ;;  %v1489_v47 = vor.u32 %v1741_v42, %v1488_v41  ;;  %v1216_v48 = vld [vmem:[#allocation2 + $0x88] sm:$0xf]  ;;  %v1673_v49 = vld [vmem:[#allocation2 + $0x94] sm:$0xf0] }
  0x40   :  { %922 = vmatpush.bf16.msrb.mxu3 %v1565_v51  ;;  %v1344_v50 = vld [vmem:[#allocation2 + $0x188] sm:$0xf]  ;;  %v1617_v51 = vor.u32 %v1773_v44, %v1616_v43  ;;  %v1705_v52 = vld [vmem:[#allocation2 + $0x194] sm:$0xf0] }
  0x41   :  { %884 = vmatpush.bf16.msrb.mxu0 %v1165_v57  ;;  %v1472_v53 = vld [vmem:[#allocation2 + $0x288] sm:$0xf]  ;;  %v1737_v54 = vld [vmem:[#allocation2 + $0x294] sm:$0xf0]  ;;  %v1217_v57 = vor.u32 %v1673_v49, %v1216_v48  ;;  %v1345_v58 = vor.u32 %v1705_v52, %v1344_v50  ;;  %v1394_v49 = vld [vmem:[#allocation2 + $0x1f8] sm:$0xf0] }
  0x42   :  { %897 = vmatpush.bf16.msrb.mxu1 %v1293_v60  ;;  %v1600_v55 = vld [vmem:[#allocation2 + $0x388] sm:$0xf]  ;;  %v1769_v56 = vld [vmem:[#allocation2 + $0x394] sm:$0xf0]  ;;  %v1473_v59 = vor.u32 %v1737_v54, %v1472_v53  ;;  %v1747_v50 = vld [vmem:[#allocation2 + $0x2ec] sm:$0xf] }
  0x43   :  { %910 = vmatpush.bf16.msrb.mxu2 %v1421_v61  ;;  %v1200_v60 = vld [vmem:[#allocation2 + $0x68] sm:$0xf]  ;;  %v1669_v61 = vld [vmem:[#allocation2 + $0x74] sm:$0xf0]  ;;  %v1601_v63 = vor.u32 %v1769_v56, %v1600_v55  ;;  %v1779_v54 = vld [vmem:[#allocation2 + $0x3ec] sm:$0xf] }
  0x44   :  { %923 = vmatpush.bf16.msrb.mxu3 %v1549_v3  ;;  %v1328_v62 = vld [vmem:[#allocation2 + $0x168] sm:$0xf]  ;;  %v1701_v0 = vld [vmem:[#allocation2 + $0x174] sm:$0xf0]  ;;  %v1201_v7 = vor.u32 %v1669_v61, %v1200_v60  ;;  %v1650_v55 = vld [vmem:[#allocation2 + $0x3f8] sm:$0xf0] }
  0x45   :  { %885 = vmatpush.bf16.msrb.mxu0 %v1149_v11  ;;  %v1456_v3 = vld [vmem:[#allocation2 + $0x268] sm:$0xf]  ;;  %v1733_v4 = vld [vmem:[#allocation2 + $0x274] sm:$0xf0]  ;;  %v1329_v9 = vor.u32 %v1701_v0, %v1328_v62  ;;  %v1679_v60 = vld [vmem:[#allocation2 + $0xcc] sm:$0xf] }
  0x46   :  { %898 = vmatpush.bf16.msrb.mxu1 %v1277_v16  ;;  %v1584_v5 = vld [vmem:[#allocation2 + $0x368] sm:$0xf]  ;;  %v1765_v6 = vld [vmem:[#allocation2 + $0x374] sm:$0xf0]  ;;  %v1457_v10 = vor.u32 %v1733_v4, %v1456_v3  ;;  %v1250_v61 = vld [vmem:[#allocation2 + $0xd8] sm:$0xf0] }
  0x47   :  { %911 = vmatpush.bf16.msrb.mxu2 %v1405_v17  ;;  %v1184_v11 = vld [vmem:[#allocation2 + $0x48] sm:$0xf]  ;;  %v1665_v12 = vld [vmem:[#allocation2 + $0x54] sm:$0xf0]  ;;  %v1585_v15 = vor.u32 %v1765_v6, %v1584_v5  ;;  %v1711_v62 = vld [vmem:[#allocation2 + $0x1cc] sm:$0xf] }
  0x48   :  { %924 = vmatpush.bf16.msrb.mxu3 %v1533_v20  ;;  %886 = vmatmul.bf16.vlgmr.msrb.gmra.mxu0 %v1895_v2  ;;  %v1312_v13 = vld [vmem:[#allocation2 + $0x148] sm:$0xf]  ;;  %v1697_v16 = vld [vmem:[#allocation2 + $0x154] sm:$0xf0]  ;;  %v1378_v0 = vld [vmem:[#allocation2 + $0x1d8] sm:$0xf0] }
  0x49   :  { %930 = vmatpush.bf16.msra.mxu0 %v1265_v21  ;;  %899 = vmatmul.bf16.vlgmr.msrb.gmra.mxu1 %v1900_v14  ;;  %v1440_v17 = vld [vmem:[#allocation2 + $0x248] sm:$0xf]  ;;  %v1729_v18 = vld [vmem:[#allocation2 + $0x254] sm:$0xf0]  ;;  %v1185_v21 = vor.u32 %v1665_v12, %v1184_v11  ;;  %v1743_v3 = vld [vmem:[#allocation2 + $0x2cc] sm:$0xf] }
  0x4a   :  { %943 = vmatpush.bf16.msra.mxu1 %v1393_v22  ;;  %912 = vmatmul.bf16.vlgmr.msrb.gmra.mxu2 %v1893_v1  ;;  %v1568_v19 = vld [vmem:[#allocation2 + $0x348] sm:$0xf]  ;;  %v1761_v20 = vld [vmem:[#allocation2 + $0x354] sm:$0xf0]  ;;  %v1313_v22 = vor.u32 %v1697_v16, %v1312_v13  ;;  %v1506_v4 = vld [vmem:[#allocation2 + $0x2d8] sm:$0xf0] }
  0x4b   :  { %956 = vmatpush.bf16.msra.mxu2 %v1521_v23  ;;  %925 = vmatmul.bf16.vlgmr.msrb.gmra.mxu3 %v1898_v8  ;;  %v1441_v23 = vor.u32 %v1729_v18, %v1440_v17  ;;  %v1168_v24 = vld [vmem:[#allocation2 + $0x28] sm:$0xf]  ;;  %v1661_v25 = vld [vmem:[#allocation2 + $0x34] sm:$0xf0]  ;;  %v1775_v5 = vld [vmem:[#allocation2 + $0x3cc] sm:$0xf] }
  0x4c   :  { %969 = vmatpush.bf16.msra.mxu3 %v1649_v27  ;;  %v1296_v26 = vld [vmem:[#allocation2 + $0x128] sm:$0xf]  ;;  %v1569_v27 = vor.u32 %v1761_v20, %v1568_v19  ;;  %v1693_v28 = vld [vmem:[#allocation2 + $0x134] sm:$0xf0]  ;;  %v1634_v6 = vld [vmem:[#allocation2 + $0x3d8] sm:$0xf0] }
  0x4d   :  { %931 = vmatpush.bf16.msra.mxu0 %v1249_v33  ;;  %v1424_v29 = vld [vmem:[#allocation2 + $0x228] sm:$0xf]  ;;  %v1725_v30 = vld [vmem:[#allocation2 + $0x234] sm:$0xf0]  ;;  %v1169_v33 = vor.u32 %v1661_v25, %v1168_v24  ;;  %v1297_v36 = vor.u32 %v1693_v28, %v1296_v26  ;;  %v1675_v11 = vld [vmem:[#allocation2 + $0xac] sm:$0xf] }
  0x4e   :  { %944 = vmatpush.bf16.msra.mxu1 %v1377_v34  ;;  %v1552_v31 = vld [vmem:[#allocation2 + $0x328] sm:$0xf]  ;;  %v1757_v32 = vld [vmem:[#allocation2 + $0x334] sm:$0xf0]  ;;  %v1425_v37 = vor.u32 %v1725_v30, %v1424_v29  ;;  %v1234_v12 = vld [vmem:[#allocation2 + $0xb8] sm:$0xf0] }
  0x4f   :  { %957 = vmatpush.bf16.msra.mxu2 %v1505_v35  ;;  %v1152_v34 = vld [vmem:[#allocation2 + $0x8] sm:$0xf]  ;;  %v1657_v35 = vld [vmem:[#allocation2 + $0x14] sm:$0xf0]  ;;  %v1553_v41 = vor.u32 %v1757_v32, %v1552_v31  ;;  %v1707_v13 = vld [vmem:[#allocation2 + $0x1ac] sm:$0xf] }
  0x50   :  { %970 = vmatpush.bf16.msra.mxu3 %v1633_v39  ;;  %v1280_v38 = vld [vmem:[#allocation2 + $0x108] sm:$0xf]  ;;  %v1689_v39 = vld [vmem:[#allocation2 + $0x114] sm:$0xf0]  ;;  %v1153_v48 = vor.u32 %v1657_v35, %v1152_v34  ;;  %v1362_v16 = vld [vmem:[#allocation2 + $0x1b8] sm:$0xf0] }
  0x51   :  { %932 = vmatpush.bf16.msra.mxu0 %v1233_v45  ;;  %v1408_v40 = vld [vmem:[#allocation2 + $0x208] sm:$0xf]  ;;  %v1721_v42 = vld [vmem:[#allocation2 + $0x214] sm:$0xf0]  ;;  %v1683_v45 = vld [vmem:[#allocation2 + $0xec] sm:$0xf]  ;;  %v1281_v52 = vor.u32 %v1689_v39, %v1280_v38 }
  0x52   :  { %945 = vmatpush.bf16.msra.mxu1 %v1361_v46  ;;  %v1536_v43 = vld [vmem:[#allocation2 + $0x308] sm:$0xf]  ;;  %v1753_v44 = vld [vmem:[#allocation2 + $0x314] sm:$0xf0]  ;;  %v1266_v46 = vld [vmem:[#allocation2 + $0xf8] sm:$0xf0]  ;;  %v1409_v53 = vor.u32 %v1721_v42, %v1408_v40 }
  0x53   :  { %958 = vmatpush.bf16.msra.mxu2 %v1489_v47  ;;  %v1715_v47 = vld [vmem:[#allocation2 + $0x1ec] sm:$0xf]  ;;  %v1537_v56 = vor.u32 %v1753_v44, %v1536_v43  ;;  %v1490_v18 = vld [vmem:[#allocation2 + $0x2b8] sm:$0xf0] }
  0x54   :  { %971 = vmatpush.bf16.msra.mxu3 %v1617_v51  ;;  %v1522_v51 = vld [vmem:[#allocation2 + $0x2f8] sm:$0xf0]  ;;  %v1739_v17 = vld [vmem:[#allocation2 + $0x2ac] sm:$0xf] }
  0x55   :  { %933 = vmatpush.bf16.msra.mxu0 %v1217_v57  ;;  %v1269_v57 = vor.u32 %v1683_v45, %v1266_v46  ;;  %v1771_v19 = vld [vmem:[#allocation2 + $0x3ac] sm:$0xf]  ;;  %v1618_v20 = vld [vmem:[#allocation2 + $0x3b8] sm:$0xf0] }
  0x56   :  { %946 = vmatpush.bf16.msra.mxu1 %v1345_v58  ;;  %v1397_v58 = vor.u32 %v1715_v47, %v1394_v49  ;;  %v1671_v24 = vld [vmem:[#allocation2 + $0x8c] sm:$0xf]  ;;  %v1218_v25 = vld [vmem:[#allocation2 + $0x98] sm:$0xf0] }
  0x57   :  { %959 = vmatpush.bf16.msra.mxu2 %v1473_v59  ;;  %v1525_v59 = vor.u32 %v1747_v50, %v1522_v51  ;;  %v1703_v26 = vld [vmem:[#allocation2 + $0x18c] sm:$0xf]  ;;  %v1346_v28 = vld [vmem:[#allocation2 + $0x198] sm:$0xf0] }
  0x58   :  { %972 = vmatpush.bf16.msra.mxu3 %v1601_v63  ;;  %v1653_v63 = vor.u32 %v1779_v54, %v1650_v55  ;;  %v1735_v29 = vld [vmem:[#allocation2 + $0x28c] sm:$0xf]  ;;  %v1474_v30 = vld [vmem:[#allocation2 + $0x298] sm:$0xf0]  ;;  %v1349_v34 = vor.u32 %v1703_v26, %v1346_v28 }
  0x59   :  { %934 = vmatpush.bf16.msra.mxu0 %v1201_v7  ;;  %v1253_v7 = vor.u32 %v1679_v60, %v1250_v61  ;;  %v1767_v31 = vld [vmem:[#allocation2 + $0x38c] sm:$0xf]  ;;  %v1602_v32 = vld [vmem:[#allocation2 + $0x398] sm:$0xf0]  ;;  %v1477_v35 = vor.u32 %v1735_v29, %v1474_v30 }
  0x5a   :  { %947 = vmatpush.bf16.msra.mxu1 %v1329_v9  ;;  %v1381_v9 = vor.u32 %v1711_v62, %v1378_v0  ;;  %v1699_v38 = vld [vmem:[#allocation2 + $0x16c] sm:$0xf]  ;;  %v1605_v39 = vor.u32 %v1767_v31, %v1602_v32  ;;  %v1330_v40 = vld [vmem:[#allocation2 + $0x178] sm:$0xf0] }
  0x5b   :  { %960 = vmatpush.bf16.msra.mxu2 %v1457_v10  ;;  %v1509_v10 = vor.u32 %v1743_v3, %v1506_v4  ;;  %v1458_v42 = vld [vmem:[#allocation2 + $0x278] sm:$0xf0]  ;;  %v1763_v43 = vld [vmem:[#allocation2 + $0x36c] sm:$0xf]  ;;  %v1333_v46 = vor.u32 %v1699_v38, %v1330_v40 }
  0x5c   :  { %973 = vmatpush.bf16.msra.mxu3 %v1585_v15  ;;  %v1637_v15 = vor.u32 %v1775_v5, %v1634_v6  ;;  %v1586_v44 = vld [vmem:[#allocation2 + $0x378] sm:$0xf0]  ;;  %v1695_v50 = vld [vmem:[#allocation2 + $0x14c] sm:$0xf] }
  0x5d   :  { %935 = vmatpush.bf16.msra.mxu0 %v1185_v21  ;;  %v1237_v21 = vor.u32 %v1675_v11, %v1234_v12  ;;  %v1186_v49 = vld [vmem:[#allocation2 + $0x58] sm:$0xf0]  ;;  %v1589_v51 = vor.u32 %v1763_v43, %v1586_v44  ;;  %v1759_v55 = vld [vmem:[#allocation2 + $0x34c] sm:$0xf] }
  0x5e   :  { %948 = vmatpush.bf16.msra.mxu1 %v1313_v22  ;;  %v1365_v22 = vor.u32 %v1707_v13, %v1362_v16  ;;  %v1442_v54 = vld [vmem:[#allocation2 + $0x258] sm:$0xf0]  ;;  %v1659_v60 = vld [vmem:[#allocation2 + $0x2c] sm:$0xf] }
  0x5f   :  { %961 = vmatpush.bf16.msra.mxu2 %v1441_v23  ;;  %v1493_v23 = vor.u32 %v1739_v17, %v1490_v18  ;;  %v1170_v61 = vld [vmem:[#allocation2 + $0x38] sm:$0xf0]  ;;  %v1691_v62 = vld [vmem:[#allocation2 + $0x12c] sm:$0xf] }
  0x60   :  { %974 = vmatpush.bf16.msra.mxu3 %v1569_v27  ;;  %v1621_v27 = vor.u32 %v1771_v19, %v1618_v20  ;;  %v1298_v0 = vld [vmem:[#allocation2 + $0x138] sm:$0xf0]  ;;  %v1723_v3 = vld [vmem:[#allocation2 + $0x22c] sm:$0xf] }
  0x61   :  { %936 = vmatpush.bf16.msra.mxu0 %v1169_v33  ;;  %v1221_v33 = vor.u32 %v1671_v24, %v1218_v25  ;;  %v1426_v4 = vld [vmem:[#allocation2 + $0x238] sm:$0xf0]  ;;  %v1755_v5 = vld [vmem:[#allocation2 + $0x32c] sm:$0xf]  ;;  %v176_v25 = vld [vmem:[%s1937_s2] sm:$0xf] }
  0x62   :  { %949 = vmatpush.bf16.msra.mxu1 %v1297_v36  ;;  %v1667_v36 = vld [vmem:[#allocation2 + $0x6c] sm:$0xf]  ;;  %v1554_v6 = vld [vmem:[#allocation2 + $0x338] sm:$0xf0]  ;;  %v818_v26 = vperm.slane %v176_v25, 0 }
  0x63   :  { %962 = vmatpush.bf16.msra.mxu2 %v1425_v37  ;;  %v1202_v37 = vld [vmem:[#allocation2 + $0x78] sm:$0xf0]  ;;  %v1655_v11 = vld [vmem:[#allocation2 + $0xc] sm:$0xf] }
  0x64   :  { %975 = vmatpush.bf16.msra.mxu3 %v1553_v41  ;;  %v1731_v41 = vld [vmem:[#allocation2 + $0x26c] sm:$0xf]  ;;  %v1205_v45 = vor.u32 %v1667_v36, %v1202_v37  ;;  %v1154_v12 = vld [vmem:[#allocation2 + $0x18] sm:$0xf0] }
  0x65   :  { %937 = vmatpush.bf16.msra.mxu0 %v1153_v48  ;;  %v1461_v47 = vor.u32 %v1731_v41, %v1458_v42  ;;  %v1663_v48 = vld [vmem:[#allocation2 + $0x4c] sm:$0xf]  ;;  %v1282_v16 = vld [vmem:[#allocation2 + $0x118] sm:$0xf0] }
  0x66   :  { %950 = vmatpush.bf16.msra.mxu1 %v1281_v52  ;;  %v1314_v52 = vld [vmem:[#allocation2 + $0x158] sm:$0xf0]  ;;  %v1687_v13 = vld [vmem:[#allocation2 + $0x10c] sm:$0xf] }
  0x67   :  { %963 = vmatpush.bf16.msra.mxu2 %v1409_v53  ;;  %v1727_v53 = vld [vmem:[#allocation2 + $0x24c] sm:$0xf]  ;;  %v1410_v18 = vld [vmem:[#allocation2 + $0x218] sm:$0xf0] }
  0x68   :  { %976 = vmatpush.bf16.msra.mxu3 %v1537_v56  ;;  %938 = vmatmul.bf16.vlgmr.msra.gmra.mxu0 %v1895_v2  ;;  %v1570_v56 = vld [vmem:[#allocation2 + $0x358] sm:$0xf0]  ;;  %v1719_v17 = vld [vmem:[#allocation2 + $0x20c] sm:$0xf] }
  0x69   :  { %982 = vmatpush.bf16.msrb.mxu0 %v1269_v57  ;;  %951 = vmatmul.bf16.vlgmr.msra.gmra.mxu1 %v1900_v14  ;;  %v1189_v57 = vor.u32 %v1663_v48, %v1186_v49  ;;  %v1751_v19 = vld [vmem:[#allocation2 + $0x30c] sm:$0xf]  ;;  %v1538_v20 = vld [vmem:[#allocation2 + $0x318] sm:$0xf0] }
  0x6a   :  { %995 = vmatpush.bf16.msrb.mxu1 %v1397_v58  ;;  %964 = vmatmul.bf16.vlgmr.msra.gmra.mxu2 %v1893_v1  ;;  %v1317_v58 = vor.u32 %v1695_v50, %v1314_v52  ;;  %v1541_v24 = vor.u32 %v1751_v19, %v1538_v20  ;;  %v819_v50 = vperm.slane %v176_v25, 1  ;;  %v820_v52 = vperm.slane %v176_v25, 2 }
  0x6b   :  { %1008 = vmatpush.bf16.msrb.mxu2 %v1525_v59  ;;  %977 = vmatmul.bf16.vlgmr.msra.gmra.mxu3 %v1898_v8  ;;  %v1445_v59 = vor.u32 %v1727_v53, %v1442_v54 }
  0x6c   :  { %1021 = vmatpush.bf16.msrb.mxu3 %v1653_v63  ;;  %v1573_v63 = vor.u32 %v1759_v55, %v1570_v56 }
  0x6d   :  { %983 = vmatpush.bf16.msrb.mxu0 %v1253_v7  ;;  %v1173_v7 = vor.u32 %v1659_v60, %v1170_v61 }
  0x6e   :  { %996 = vmatpush.bf16.msrb.mxu1 %v1381_v9  ;;  %v1301_v9 = vor.u32 %v1691_v62, %v1298_v0 }
  0x6f   :  { %1009 = vmatpush.bf16.msrb.mxu2 %v1509_v10  ;;  %v1429_v10 = vor.u32 %v1723_v3, %v1426_v4 }
  0x70   :  { %1022 = vmatpush.bf16.msrb.mxu3 %v1637_v15  ;;  %v1557_v15 = vor.u32 %v1755_v5, %v1554_v6 }
  0x71   :  { %984 = vmatpush.bf16.msrb.mxu0 %v1237_v21  ;;  %v1157_v21 = vor.u32 %v1655_v11, %v1154_v12 }
  0x72   :  { %997 = vmatpush.bf16.msrb.mxu1 %v1365_v22  ;;  %v1285_v22 = vor.u32 %v1687_v13, %v1282_v16 }
  0x73   :  { %1010 = vmatpush.bf16.msrb.mxu2 %v1493_v23  ;;  %v1413_v23 = vor.u32 %v1719_v17, %v1410_v18 }
  0x74   :  { %1023 = vmatpush.bf16.msrb.mxu3 %v1621_v27 }
  0x75   :  { %985 = vmatpush.bf16.msrb.mxu0 %v1221_v33 }
  0x76   :  { %998 = vmatpush.bf16.msrb.mxu1 %v1349_v34 }
  0x77   :  { %1011 = vmatpush.bf16.msrb.mxu2 %v1477_v35 }
  0x78   :  { %1024 = vmatpush.bf16.msrb.mxu3 %v1605_v39 }
  0x79   :  { %986 = vmatpush.bf16.msrb.mxu0 %v1205_v45 }
  0x7a   :  { %999 = vmatpush.bf16.msrb.mxu1 %v1333_v46 }
  0x7b   :  { %1012 = vmatpush.bf16.msrb.mxu2 %v1461_v47 }
  0x7c   :  { %1025 = vmatpush.bf16.msrb.mxu3 %v1589_v51 }
  0x7d   :  { %987 = vmatpush.bf16.msrb.mxu0 %v1189_v57  ;;  %v821_v57 = vperm.slane %v176_v25, 3 }
  0x7e   :  { %1000 = vmatpush.bf16.msrb.mxu1 %v1317_v58 }
  0x7f   :  { %1013 = vmatpush.bf16.msrb.mxu2 %v1445_v59 }
  0x80   :  { %1026 = vmatpush.bf16.msrb.mxu3 %v1573_v63 }
  0x81   :  { %988 = vmatpush.bf16.msrb.mxu0 %v1173_v7 }
  0x82   :  { %1001 = vmatpush.bf16.msrb.mxu1 %v1301_v9 }
  0x83   :  { %1014 = vmatpush.bf16.msrb.mxu2 %v1429_v10 }
  0x84   :  { %1027 = vmatpush.bf16.msrb.mxu3 %v1557_v15 }
  0x85   :  { %989 = vmatpush.bf16.msrb.mxu0 %v1157_v21 }
  0x86   :  { %1002 = vmatpush.bf16.msrb.mxu1 %v1285_v22 }
  0x87   :  { %1015 = vmatpush.bf16.msrb.mxu2 %v1413_v23 }
  0x88   :  { %1028 = vmatpush.bf16.msrb.mxu3 %v1541_v24  ;;  %990 = vmatmul.bf16.vlgmr.msrb.gmra.mxu0 %v1895_v2 }
  0x89   :  { %1003 = vmatmul.bf16.vlgmr.msrb.gmra.mxu1 %v1900_v14 }
  0x8a   :  { %1016 = vmatmul.bf16.vlgmr.msrb.gmra.mxu2 %v1893_v1 }
  0x8b   :  { %1029 = vmatmul.bf16.vlgmr.msrb.gmra.mxu3 %v1898_v8 }
  0xa8   :  { %v835_v27 = vpop.f32.mrf.mxu0 }
  0xa9   :  { %v836_v28 = vadd.f32 %v835_v27, %v818_v26 }
  0xac   :  { %v848_v29 = vpop.f32.mrf.mxu1 }
  0xad   :  { %v849_v30 = vadd.f32 %v848_v29, %v836_v28 }
  0xaf   :  { %v861_v31 = vpop.f32.mrf.mxu2 }
  0xb0   :  { %v862_v32 = vadd.f32 %v861_v31, %v849_v30  ;;  %v874_v33 = vpop.f32.mrf.mxu3  ;;  %v837_v2 = vpop.f32.mrf.mxu0 }
  0xb2   :  { %v875_v34 = vadd.f32 %v874_v33, %v862_v32 }
  0xb4   :  { %v850_v35 = vpop.f32.mrf.mxu1 }
  0xb7   :  { %v863_v14 = vpop.f32.mrf.mxu2 }
  0xb8   :  { %v876_v36 = vpop.f32.mrf.mxu3 }
  0xc5   :  { %v887_v1 = vpop.f32.mrf.mxu0 }
  0xc6   :  { %v900_v37 = vpop.f32.mrf.mxu1  ;;  %v888_v53 = vadd.f32 %v887_v1, %v819_v50 }
  0xc8   :  { %v901_v55 = vadd.f32 %v900_v37, %v888_v53 }
  0xcd   :  { %v913_v8 = vpop.f32.mrf.mxu2  ;;  %v889_v39 = vpop.f32.mrf.mxu0 }
  0xce   :  { %v926_v38 = vpop.f32.mrf.mxu3  ;;  %v902_v40 = vpop.f32.mrf.mxu1  ;;  %v914_v58 = vadd.f32 %v913_v8, %v901_v55 }
  0xd0   :  { %v927_v63 = vadd.f32 %v926_v38, %v914_v58 }
  0xd2   :  { %1787 = vtanh.f32 %v927_v63 }
  0xd3   :  { %1789 = vtanh.f32 %v875_v34 }
  0xd5   :  { %v915_v41 = vpop.f32.mrf.mxu2 }
  0xd6   :  { %v928_v42 = vpop.f32.mrf.mxu3 }
  0xd8   :  { %v1788_v11 = vpop.eup %1787 }
  0xd9   :  { %v1790_v12 = vpop.eup %1789  ;;  %v1039_v15 = vmul.f32 0.044194173, %v1788_v11 }
  0xda   :  { %v1038_v18 = vmul.f32 0.044194173, %v1790_v12 }
  0xdb   :  { %v1044_v22 = vsel %vm1042_vm0, %v1039_v15, -inf }
  0xdc   :  { %v1043_v23 = vsel %vm1042_vm0, %v1038_v18, -inf }
  0xdd   :  { %v1047_v26 = vmax.f32 %v1043_v23, %v1044_v22 }
  0xe5   :  { %v939_v43 = vpop.f32.mrf.mxu0 }
  0xe6   :  { %v952_v44 = vpop.f32.mrf.mxu1  ;;  %v940_v54 = vadd.f32 %v939_v43, %v820_v52 }
  0xe8   :  { %v953_v56 = vadd.f32 %v952_v44, %v940_v54 }
  0xed   :  { %v965_v45 = vpop.f32.mrf.mxu2  ;;  %v941_v47 = vpop.f32.mrf.mxu0 }
  0xee   :  { %v978_v46 = vpop.f32.mrf.mxu3  ;;  %v954_v48 = vpop.f32.mrf.mxu1  ;;  %v966_v59 = vadd.f32 %v965_v45, %v953_v56  ;;  %v1860_v56 = vmov 0.0  }
  0xf0   :  { %v979_v0 = vadd.f32 %v978_v46, %v966_v59 }
  0xf2   :  { %1791 = vtanh.f32 %v979_v0 }
  0xf5   :  { %v967_v49 = vpop.f32.mrf.mxu2 }
  0xf6   :  { %v980_v51 = vpop.f32.mrf.mxu3  ;;  %v1087_v49 = vld [vmem:[%s1938_s3] sm:$0xf]  ;;  %s1861_s3 = smov [#allocation5]  }
  0xf7   :  { %vm1088_vm2 = vcmp.lt.s32.totalorder %v1087_v49, 0  ;;  %s1130_s25 = sshll.u32 %s1861_s3, 4  ;;  %s1131_s25 = int_to_ptr.vmem [resolvable:$true] %s1130_s25 }
  0xf8   :  { %v1792_v13 = vpop.eup %1791 }
  0xf9   :  { %v1040_v19 = vmul.f32 0.044194173, %v1792_v13 }
  0xfb   :  { %v1045_v24 = vsel %vm1042_vm0, %v1040_v19, -inf }
 0x105   :  { %v991_v60 = vpop.f32.mrf.mxu0 }
 0x106   :  { %v992_v61 = vadd.f32 %v991_v60, %v821_v57  ;;  %v1004_v62 = vpop.f32.mrf.mxu1  ;;  %v1089_v57 = vsel %vm1088_vm2, 2.0, %v1860_v56 }
 0x108   :  { %v1005_v3 = vadd.f32 %v1004_v62, %v992_v61 }
 0x10d   :  { %v1017_v4 = vpop.f32.mrf.mxu2  ;;  %v993_v7 = vpop.f32.mrf.mxu0 }
 0x10e   :  { %v1018_v5 = vadd.f32 %v1017_v4, %v1005_v3  ;;  %v1030_v6 = vpop.f32.mrf.mxu3  ;;  %v1006_v9 = vpop.f32.mrf.mxu1  ;;  %v1120_v3 = vlaneseq }
 0x110   :  { %v1031_v10 = vadd.f32 %v1030_v6, %v1018_v5  ;;  %vm1122_vm8 = vcmp.lt.s32.totalorder %v1120_v3, 512 }
 0x112   :  { %1793 = vtanh.f32 %v1031_v10 }
 0x115   :  { %v1019_v16 = vpop.f32.mrf.mxu2 }
 0x116   :  { %v1032_v17 = vpop.f32.mrf.mxu3 }
 0x118   :  { %v1794_v20 = vpop.eup %1793 }
 0x119   :  { %v1041_v21 = vmul.f32 0.044194173, %v1794_v20 }
 0x11b   :  { %v1046_v25 = vsel %vm1042_vm0, %v1041_v21, -inf }
 0x11c   :  { %v1048_v27 = vmax.f32 %v1045_v24, %v1046_v25 }
 0x11e   :  { %v1049_v28 = vmax.f32 %v1047_v26, %v1048_v27 }
 0x120   :  { %1050 = vmax.xlane.f32.xlu0 %v1049_v28 }
 0x193   :  { %v1051_v29 = vpop.xlane.xlu0 %1050 }
 0x194   :  { %v1052_v30 = vsub.f32 %v1038_v18, %v1051_v29  ;;  %v1053_v31 = vsub.f32 %v1039_v15, %v1051_v29  ;;  %v1054_v32 = vsub.f32 %v1040_v19, %v1051_v29  ;;  %v1055_v33 = vsub.f32 %v1041_v21, %v1051_v29 }
 0x196   :  { %v1056_v34 = vmul.f32 1.442695, %v1052_v30  ;;  %v1058_v2 = vmul.f32 1.442695, %v1053_v31  ;;  %v1060_v35 = vmul.f32 1.442695, %v1054_v32 }
 0x197   :  { %v1062_v14 = vmul.f32 1.442695, %v1055_v33 }
 0x198   :  { %1795 = vpow2.f32 %v1056_v34 }
 0x199   :  { %1797 = vpow2.f32 %v1058_v2 }
 0x19a   :  { %1799 = vpow2.f32 %v1060_v35 }
 0x19b   :  { %1801 = vpow2.f32 %v1062_v14 }
 0x19e   :  { %v1796_v36 = vpop.eup %1795 }
 0x19f   :  { %v1798_v1 = vpop.eup %1797  ;;  %v1064_v37 = vsel %vm1042_vm0, %v1796_v36, 0.0 }
 0x1a0   :  { %v1800_v8 = vpop.eup %1799  ;;  %v1065_v38 = vsel %vm1042_vm0, %v1798_v1, 0.0 }
 0x1a1   :  { %v1802_v39 = vpop.eup %1801  ;;  %v1066_v40 = vadd.f32 %v1065_v38, %v1064_v37  ;;  %v1067_v41 = vsel %vm1042_vm0, %v1800_v8, 0.0 }
 0x1a2   :  { %v1069_v43 = vsel %vm1042_vm0, %v1802_v39, 0.0 }
 0x1a3   :  { %v1068_v42 = vadd.f32 %v1067_v41, %v1066_v40 }
 0x1a5   :  { %v1070_v44 = vadd.f32 %v1069_v43, %v1068_v42 }
 0x1a7   :  { %1071 = vadd.xlane.f32.xlu0 %v1070_v44 }
 0x21a   :  { %v1072_v45 = vpop.xlane.xlu0 %1071 }
 0x21b   :  { %1803 = vrcp.f32 %v1072_v45  ;;  %v1084_v50 = vand.u32 2147483648, %v1072_v45  ;;  %v1082_v52 = vand.u32 2147483647, %v1072_v45  ;;  %vm1078_vm3 = vweird.f32 %v1072_v45 }
 0x21d   :  { %v1085_v54 = vor.u32 1.1754944e-38, %v1084_v50  ;;  %vm1083_vm5 = vcmp.eq.f32.partialorder %v1082_v52, 8.507059e+37 }
 0x221   :  { %v1804_v46 = vpop.eup %1803 }
 0x222   :  { %v1074_v47 = vmul.f32 %v1804_v46, %v1072_v45  ;;  %vm1079_vm1 = vweird.f32 %v1804_v46 }
 0x223   :  { %vm1080_vm4 = vmor %vm1078_vm3, %vm1079_vm1 }
 0x224   :  { %v1075_v48 = vsub.f32 1.0, %v1074_v47 }
 0x226   :  { %v1076_v51 = vmul.f32 %v1804_v46, %v1075_v48 }
 0x228   :  { %v1077_v53 = vadd.f32 %v1804_v46, %v1076_v51 }
 0x22a   :  { %v1081_v55 = vsel %vm1080_vm4, %v1804_v46, %v1077_v53 }
 0x22b   :  { %v1086_v58 = vsel %vm1083_vm5, %v1085_v54, %v1081_v55 }
 0x22c   :  { %v1091_v59 = vperm.slane %v1086_v58, 0 }
 0x22e   :  { %v1093_v60 = vmul.f32 %v1091_v59, %v1089_v57 }
 0x230   :  { %v1095_v61 = vperm.slane %v1093_v60, 0  ;;  %v1096_v62 = vperm.slane %v1093_v60, 1  ;;  %v1097_v63 = vperm.slane %v1093_v60, 2  ;;  %v1098_v0 = vperm.slane %v1093_v60, 3 }
 0x232   :  { %v1104_v4 = vmul.f32 %v1798_v1, %v1096_v62  ;;  %v1105_v5 = vmul.f32 %v1800_v8, %v1097_v63  ;;  %v1106_v6 = vmul.f32 %v1802_v39, %v1098_v0  ;;  %v1103_v7 = vmul.f32 %v1796_v36, %v1095_v61 }
 0x234   :  { %v1111_v9 = vrot.slane %v1104_v4, 7  ;;  %v1112_v10 = vrot.slane %v1105_v5, 6  ;;  %v1113_v11 = vrot.slane %v1106_v6, 5 }
 0x236   :  { %v1114_v12 = vsel %vm1042_vm0, %v1103_v7, %v1111_v9  ;;  %v1116_v13 = vsel %vm1115_vm6, %v1112_v10, %v1113_v11 }
 0x237   :  { %v1118_v15 = vsel %vm1117_vm7, %v1114_v12, %v1116_v13 }
 0x238   :  { %1124 = vst.msk [vmem:[#allocation5] sm:$0xf] %vm1122_vm8, %v1118_v15 }
 0x239   :  { %1135 = dma.vmem_to_hbm [thread:$0]  %s1131_s25, 64, %s1133_s28, [#allocation4]  }
 0x23a   :  { %1855 = dma.done.wait [#allocation4], 64  }
 0x23b   :  { %1856 = vsyncadd [#allocation4], 4294967232 }
 0x23c   :  { %1140 = vsyncpa [#allocation3], 1 }
 0x23d   :  { %1141 = vsyncpa [#allocation4], 1 }

</bundles_post_ra>
